<compile_context>
chip_gen: v5e
topology: v5e:2x2
jax: 0.10.0
libtpu: 0.0.40
codegen_flags: <defaults>
</compile_context>

<pallas_src>
import functools
import math

import jax
import jax.numpy as jnp
from jax import lax
from jax.experimental import pallas as pl
from jax.experimental.pallas import tpu as pltpu


def _label_smoothing_kernel(x_ref, tgt_ref, out_ref, acc_ref, cnt_ref, *,
                            padding_idx, confidence, fill, const_per_row):
    i = pl.program_id(0)

    # Reset accumulators on the first grid step.
    @pl.when(i == 0)
    def _():
        acc_ref[...] = jnp.zeros_like(acc_ref)
        cnt_ref[...] = jnp.zeros_like(cnt_ref)

    tile_n, V = x_ref.shape

    # Column indices, hoisted once per tile and reused by every 8-row group.
    col = lax.broadcasted_iota(jnp.int32, (8, V), 1)

    # Stream 8-row sublane groups straight into the (8, V) accumulator.
    # Per element: cmp, select(scale), mul, select(row mask), add (+cast if bf16).
    for g in range(tile_n // 8):
        xg = x_ref[g * 8:(g + 1) * 8, :].astype(jnp.float32)   # (8, V)
        tg = tgt_ref[g * 8:(g + 1) * 8, :]                     # (8, 1) int32
        keep = tg != padding_idx                               # (8, 1) bool
        scale = jnp.where(col == tg, confidence, fill)         # (8, V)
        # Select (not multiply) so garbage rows past N cannot inject NaN/Inf.
        acc_ref[...] += jnp.where(keep, scale * xg, 0.0)
        cnt_ref[...] += keep.astype(jnp.float32)

    # Single cross-lane reduce + lane-dense store, once, on the last step.
    @pl.when(i == pl.num_programs(0) - 1)
    def _():
        total = jnp.sum(acc_ref[...])
        # For kept rows the padding column always received weight `fill`, so
        # its accumulated value is exactly the correction fill * sum(x[:,pad]).
        pad_col = jnp.sum(acc_ref[:, padding_idx:padding_idx + 1])
        k = jnp.sum(cnt_ref[...])                    # number of kept rows
        loss = k * const_per_row - total + pad_col
        out_ref[...] = jnp.zeros_like(out_ref) + loss


def _round_up(a, b):
    return (a + b - 1) // b * b


def label_smoothing_loss(x, target, *, size, padding_idx, smoothing,
                         tile_n=None, target_block_bytes=8 * 1024 * 1024):
    """x: (N, size) log-probs (f32 or bf16), target: (N,) int -> scalar loss."""
    N, V = x.shape
    assert V == size
    tgt = target.astype(jnp.int32)

    confidence = 1.0 - smoothing
    if size > 2:
        fill = smoothing / (size - 2)
    else:
        # Inherited from the PyTorch module's division by (size - 2).
        assert smoothing == 0.0, "size <= 2 requires smoothing == 0"
        fill = 0.0
    log_conf = math.log(confidence) if confidence > 0.0 else 0.0   # 0*log0 := 0
    log_fill = math.log(fill) if fill > 0.0 else 0.0               # 0*log0 := 0
    # Constant loss contribution of one kept row.
    const_per_row = confidence * log_conf + (size - 2) * fill * log_fill

    # Row-tile sizing: ~target_block_bytes per block, multiple of the dtype's
    # min sublane granularity (8 f32 / 16 bf16 / 32 int8), capped near N.
    itemsize = jnp.dtype(x.dtype).itemsize
    sub = max(8, 32 // itemsize)
    if tile_n is None:
        bytes_per_row = max(1, itemsize * V)
        tile_n = max(sub, (target_block_bytes // bytes_per_row) // sub * sub)
    tile_n = max(sub, (tile_n // sub) * sub)
    tile_n = min(tile_n, _round_up(max(N, 1), sub))

    num_blocks = (N + tile_n - 1) // tile_n
    padded_rows = num_blocks * tile_n

    # Only the tiny target vector is padded (padding_idx rows contribute 0);
    # x is streamed unpadded — the ragged tail of the last block is masked
    # row-wise in the kernel via tgt == padding_idx.
    if padded_rows != N:
        tgt = jnp.pad(tgt, ((0, padded_rows - N),), constant_values=padding_idx)
    tgt2d = tgt.reshape(padded_rows, 1)

    kernel = functools.partial(
        _label_smoothing_kernel, padding_idx=padding_idx,
        confidence=confidence, fill=fill, const_per_row=const_per_row)

    # NOTE: kernel is tuned for V >= 128; at V << 128 (like the self-test's
    # V=32) lane utilization is only V/128, which is fine for a smoke test.
    out = pl.pallas_call(
        kernel,
        out_shape=jax.ShapeDtypeStruct((8, 128), jnp.float32),
        grid_spec=pltpu.PrefetchScalarGridSpec(
            num_scalar_prefetch=0,
            grid=(num_blocks,),
            in_specs=[
                pl.BlockSpec((tile_n, V), lambda i: (i, 0)),
                pl.BlockSpec((tile_n, 1), lambda i: (i, 0)),
            ],
            out_specs=pl.BlockSpec((8, 128), lambda i: (0, 0)),
            scratch_shapes=[
                pltpu.VMEM((8, V), jnp.float32),
                pltpu.VMEM((8, 1), jnp.float32),
            ],
        ),
        compiler_params=pltpu.CompilerParams(
            dimension_semantics=("arbitrary",),
            vmem_limit_bytes=32 * 1024 * 1024,
        ),
    )(x, tgt2d)
    return out[0, 0]


def _reference(x, target, *, size, padding_idx, smoothing):
    confidence = 1.0 - smoothing
    fill = smoothing / (size - 2)
    V = x.shape[1]
    col = jnp.arange(V)[None, :]
    tgt = target[:, None]
    td = jnp.where(col == tgt, confidence, fill)
    td = jnp.where(col == padding_idx, 0.0, td)
    td = jnp.where(tgt == padding_idx, 0.0, td)
    x32 = x.astype(jnp.float32)
    kl = jnp.where(td > 0, td * (jnp.log(jnp.where(td > 0, td, 1.0)) - x32), 0.0)
    return jnp.sum(kl)


if __name__ == "__main__":
    SIZE = 32          # vocab size (module's `size`)
    PADDING_IDX = 0
    SMOOTHING = 0.1

    key = jax.random.PRNGKey(0)
    k1, k2, k3, k4 = jax.random.split(key, 4)

    # Case 1: N multiple of 8 (clean path), includes a padded token.
    N1 = 8
    x1 = jax.nn.log_softmax(
        jax.random.normal(k1, (N1, SIZE), dtype=jnp.float32), axis=-1)
    t1 = jax.random.randint(k2, (N1,), 0, SIZE, dtype=jnp.int32)
    t1 = t1.at[3].set(PADDING_IDX)
    loss1 = jax.block_until_ready(
        label_smoothing_loss(x1, t1, size=SIZE, padding_idx=PADDING_IDX,
                             smoothing=SMOOTHING))
    ref1 = _reference(x1, t1, size=SIZE, padding_idx=PADDING_IDX,
                      smoothing=SMOOTHING)
    assert jnp.allclose(loss1, ref1, rtol=1e-4, atol=1e-4), (loss1, ref1)

    # Case 2: ragged N (exercises the pad-free masking of the last block).
    N2 = 13
    x2 = jax.nn.log_softmax(
        jax.random.normal(k3, (N2, SIZE), dtype=jnp.float32), axis=-1)
    t2 = jax.random.randint(k4, (N2,), 0, SIZE, dtype=jnp.int32)
    t2 = t2.at[5].set(PADDING_IDX)
    loss2 = jax.block_until_ready(
        label_smoothing_loss(x2, t2, size=SIZE, padding_idx=PADDING_IDX,
                             smoothing=SMOOTHING))
    ref2 = _reference(x2, t2, size=SIZE, padding_idx=PADDING_IDX,
                      smoothing=SMOOTHING)
    assert jnp.allclose(loss2, ref2, rtol=1e-4, atol=1e-4), (loss2, ref2)

    # TODO(synk): the PyTorch module also caches self.true_dist as a buffer;
    # the full (N, V) smoothed distribution is intentionally never materialized.
    print("KERNEL_OK")
</pallas_src>

<mosaic_0001>
module attributes {stable_mosaic.version = 11 : i64} {
  func.func @_label_smoothing_kernel(%arg0: i32, %arg1: memref<8x32xf32, #tpu.memory_space<vmem>>, %arg2: memref<8x1xi32, #tpu.memory_space<vmem>>, %arg3: memref<8x128xf32, #tpu.memory_space<vmem>>, %arg4: memref<8x32xf32, #tpu.memory_space<vmem>>, %arg5: memref<8x1xf32, #tpu.memory_space<vmem>>) attributes {dimension_semantics = [#tpu.dimension_semantics<arbitrary>], iteration_bounds = array<i64: 1>, scalar_prefetch = 0 : i64, scratch_operands = 2 : i64, tpu.core_type = #tpu.core_type<tc>, window_params = [{transform_indices = @transform_0, window_bounds = array<i64: 8, 32>}, {transform_indices = @transform_1, window_bounds = array<i64: 8, 1>}, {pipeline_mode = #tpu.pipeline_mode<synchronous>, transform_indices = @transform_2, window_bounds = array<i64: 8, 128>}]} {
    %c0_i32 = arith.constant 0 : i32
    %0 = arith.cmpi eq, %arg0, %c0_i32 : i32
    %1 = arith.extui %0 : i1 to i32
    %c0_i32_0 = arith.constant 0 : i32
    %2 = arith.cmpi ne, %1, %c0_i32_0 : i32
    scf.if %2 {
      %cst_17 = arith.constant 0.000000e+00 : f32
      %29 = vector.broadcast %cst_17 : f32 to vector<8x32xf32>
      %c0_18 = arith.constant 0 : index
      %c0_19 = arith.constant 0 : index
      %30 = vector.load %arg4[%c0_18, %c0_19] : memref<8x32xf32, #tpu.memory_space<vmem>>, vector<8x32xf32>
      tpu.vector_store %arg4[%c0_18, %c0_19], %29 {strides = array<i32>} : memref<8x32xf32, #tpu.memory_space<vmem>>, vector<8x32xf32>,
      %cst_20 = arith.constant 0.000000e+00 : f32
      %31 = vector.broadcast %cst_20 : f32 to vector<8x1xf32>
      %c0_21 = arith.constant 0 : index
      %c0_22 = arith.constant 0 : index
      %32 = vector.load %arg5[%c0_21, %c0_22] : memref<8x1xf32, #tpu.memory_space<vmem>>, vector<8x1xf32>
      tpu.vector_store %arg5[%c0_21, %c0_22], %31 {strides = array<i32>} : memref<8x1xf32, #tpu.memory_space<vmem>>, vector<8x1xf32>,
    } else {
    }
    %3 = tpu.iota {dimensions = array<i32: 1>} : vector<8x32xi32>
    %c0 = arith.constant 0 : index
    %c0_1 = arith.constant 0 : index
    %4 = vector.load %arg1[%c0, %c0_1] : memref<8x32xf32, #tpu.memory_space<vmem>>, vector<8x32xf32>
    %c0_2 = arith.constant 0 : index
    %c0_3 = arith.constant 0 : index
    %5 = vector.load %arg2[%c0_2, %c0_3] : memref<8x1xi32, #tpu.memory_space<vmem>>, vector<8x1xi32>
    %c0_i32_4 = arith.constant 0 : i32
    %6 = vector.broadcast %c0_i32_4 : i32 to vector<8x1xi32>
    %7 = arith.cmpi ne, %5, %6 : vector<8x1xi32>
    %8 = vector.broadcast %5 : vector<8x1xi32> to vector<8x32xi32>
    %9 = arith.cmpi eq, %3, %8 : vector<8x32xi32>
    %cst = arith.constant 0.899999976 : f32
    %cst_5 = arith.constant 0.00333333341 : f32
    %10 = vector.broadcast %cst : f32 to vector<8x32xf32>
    %11 = vector.broadcast %cst_5 : f32 to vector<8x32xf32>
    %12 = arith.select %9, %10, %11 : vector<8x32xi1>, vector<8x32xf32>
    %c0_6 = arith.constant 0 : index
    %c0_7 = arith.constant 0 : index
    %13 = vector.load %arg4[%c0_6, %c0_7] : memref<8x32xf32, #tpu.memory_space<vmem>>, vector<8x32xf32>
    %14 = arith.mulf %12, %4 : vector<8x32xf32>
    %cst_8 = arith.constant 0.000000e+00 : f32
    %15 = vector.shape_cast %7 : vector<8x1xi1> to vector<8x1xi1>
    %16 = vector.broadcast %15 : vector<8x1xi1> to vector<8x32xi1>
    %17 = vector.broadcast %cst_8 : f32 to vector<8x32xf32>
    %18 = arith.select %16, %14, %17 : vector<8x32xi1>, vector<8x32xf32>
    %19 = arith.addf %13, %18 : vector<8x32xf32>
    %c0_9 = arith.constant 0 : index
    %c0_10 = arith.constant 0 : index
    %20 = vector.load %arg4[%c0_9, %c0_10] : memref<8x32xf32, #tpu.memory_space<vmem>>, vector<8x32xf32>
    tpu.vector_store %arg4[%c0_9, %c0_10], %19 {strides = array<i32>} : memref<8x32xf32, #tpu.memory_space<vmem>>, vector<8x32xf32>,
    %c0_11 = arith.constant 0 : index
    %c0_12 = arith.constant 0 : index
    %21 = vector.load %arg5[%c0_11, %c0_12] : memref<8x1xf32, #tpu.memory_space<vmem>>, vector<8x1xf32>
    %22 = arith.extui %7 : vector<8x1xi1> to vector<8x1xi32>
    %23 = arith.sitofp %22 : vector<8x1xi32> to vector<8x1xf32>
    %24 = arith.addf %21, %23 : vector<8x1xf32>
    %c0_13 = arith.constant 0 : index
    %c0_14 = arith.constant 0 : index
    %25 = vector.load %arg5[%c0_13, %c0_14] : memref<8x1xf32, #tpu.memory_space<vmem>>, vector<8x1xf32>
    tpu.vector_store %arg5[%c0_13, %c0_14], %24 {strides = array<i32>} : memref<8x1xf32, #tpu.memory_space<vmem>>, vector<8x1xf32>,
    %c0_i32_15 = arith.constant 0 : i32
    %26 = arith.cmpi eq, %arg0, %c0_i32_15 : i32
    %27 = arith.extui %26 : i1 to i32
    %c0_i32_16 = arith.constant 0 : i32
    %28 = arith.cmpi ne, %27, %c0_i32_16 : i32
    scf.if %28 {
      %c0_17 = arith.constant 0 : index
      %c0_18 = arith.constant 0 : index
      %29 = vector.load %arg4[%c0_17, %c0_18] : memref<8x32xf32, #tpu.memory_space<vmem>>, vector<8x32xf32>
      %30 = vector.shape_cast %29 : vector<8x32xf32> to vector<1x8x32xf32>
      %cst_19 = arith.constant dense<0.000000e+00> : vector<1xf32>
      %31 = vector.multi_reduction <add>, %30, %cst_19 [1, 2] : vector<1x8x32xf32> to vector<1xf32>
      %32 = vector.shape_cast %31 : vector<1xf32> to vector<1x1x1xf32>
      %33 = vector.extract %32[0, 0, 0] : f32 from vector<1x1x1xf32>
      %c0_20 = arith.constant 0 : index
      %c0_21 = arith.constant 0 : index
      %34 = vector.load %arg4[%c0_20, %c0_21] : memref<8x32xf32, #tpu.memory_space<vmem>>, vector<8x1xf32>
      %35 = vector.shape_cast %34 : vector<8x1xf32> to vector<1x8x1xf32>
      %cst_22 = arith.constant dense<0.000000e+00> : vector<1xf32>
      %36 = vector.multi_reduction <add>, %35, %cst_22 [1, 2] : vector<1x8x1xf32> to vector<1xf32>
      %37 = vector.shape_cast %36 : vector<1xf32> to vector<1x1x1xf32>
      %38 = vector.extract %37[0, 0, 0] : f32 from vector<1x1x1xf32>
      %c0_23 = arith.constant 0 : index
      %c0_24 = arith.constant 0 : index
      %39 = vector.load %arg5[%c0_23, %c0_24] : memref<8x1xf32, #tpu.memory_space<vmem>>, vector<8x1xf32>
      %40 = vector.shape_cast %39 : vector<8x1xf32> to vector<1x8x1xf32>
      %cst_25 = arith.constant dense<0.000000e+00> : vector<1xf32>
      %41 = vector.multi_reduction <add>, %40, %cst_25 [1, 2] : vector<1x8x1xf32> to vector<1xf32>
      %42 = vector.shape_cast %41 : vector<1xf32> to vector<1x1x1xf32>
      %43 = vector.extract %42[0, 0, 0] : f32 from vector<1x1x1xf32>
      %cst_26 = arith.constant -0.665202737 : f32
      %44 = arith.mulf %43, %cst_26 : f32
      %45 = arith.subf %44, %33 : f32
      %46 = arith.addf %45, %38 : f32
      %cst_27 = arith.constant 0.000000e+00 : f32
      %47 = vector.broadcast %cst_27 : f32 to vector<8x128xf32>
      %48 = vector.broadcast %46 : f32 to vector<8x128xf32>
      %49 = arith.addf %47, %48 : vector<8x128xf32>
      %c0_28 = arith.constant 0 : index
      %c0_29 = arith.constant 0 : index
      %50 = vector.load %arg3[%c0_28, %c0_29] : memref<8x128xf32, #tpu.memory_space<vmem>>, vector<8x128xf32>
      tpu.vector_store %arg3[%c0_28, %c0_29], %49 {strides = array<i32>} : memref<8x128xf32, #tpu.memory_space<vmem>>, vector<8x128xf32>,
    } else {
    }
    return
  }
  func.func @transform_0(%arg0: i32) -> (i32, i32) {
    %c0_i32 = arith.constant 0 : i32
    %c0_i32_0 = arith.constant 0 : i32
    return %arg0, %c0_i32 : i32, i32
  }
  func.func @transform_1(%arg0: i32) -> (i32, i32) {
    %c0_i32 = arith.constant 0 : i32
    %c0_i32_0 = arith.constant 0 : i32
    return %arg0, %c0_i32 : i32, i32
  }
  func.func @transform_2(%arg0: i32) -> (i32, i32) {
    %c0_i32 = arith.constant 0 : i32
    %c0_i32_0 = arith.constant 0 : i32
    %c0_i32_1 = arith.constant 0 : i32
    return %c0_i32, %c0_i32_0 : i32, i32
  }
}

</mosaic_0001>

<bundles_post_ra>
// kernel: tpu_custom_call.1
= control target key start
LH: loop header
LB: loop body
LE: loop exit
PB: predicated region body
PF: predicated region fallthrough
CT: control target
= control target key end

     0   :  { %vm18_vm0 = vcmask 7168   ;;  %v141_v1 = vmov 0   ;;  %v142_v2 = vmov 0.0   ;;  %s176_s0 = inlined_call_operand.vmem [shape: f32[8,32], index: 0, kind: input, shape index: {}]   ;;  %s177_s1 = inlined_call_operand.vmem [shape: s32[8,1], index: 1, kind: input, shape index: {}]   ;;  %s178_s2 = inlined_call_operand.hbm [shape: f32[8,128], index: 2, kind: output, shape index: {}]  }
   0x1   :  { %v23_v0 = vld [vmem:[%s177_s1] sm:$0xff]  ;;  %114 = vset.pattern.permute.xlu0 %v141_v1  ;;  %19 = vst.msk [vmem:[#allocation3] sm:$0xff] %vm18_vm0, %v142_v2 }
   0x2   :  { %7 = vsyncpa [#allocation5], 0  ;;  %26 = vperm.xlu0 %114, %v23_v0   ;;  %vm24_vm1 = vcmp.ne.s32.totalorder %v23_v0, 0  ;;  %vm16_vm2 = vcmask 261120   ;;  %v20_v9 = vlaneseq  ;;  %v22_v12 = vld [vmem:[%s176_s0] sm:$0xff]  ;;  %s144_s15 = smov [#allocation4]  }
   0x3   :  { %v103_v3 = vsel %vm24_vm1, 1.0, %v142_v2  ;;  %v32_v4 = vsel %vm24_vm1, 1, %v141_v1  ;;  %17 = vst.msk [vmem:[#allocation2] sm:$0xff] %vm16_vm2, %v142_v2  ;;  %v143_v13 = vmov 0.0033333334   ;;  %s92_s16 = sshll.u32 %s144_s15, 4  ;;  %s93_s16 = int_to_ptr.vmem [resolvable:$true] %s92_s16 }
   0x4   :  { %v21_v10 = vand.u32 127, %v20_v9  ;;  %s94_s20 = sshll.u32 %s178_s2, 4  ;;  %s95_s20 = int_to_ptr.hbm [resolvable:$true] %s94_s20 }
   0x8   :  { %v41_v5 = vld [vmem:[#allocation3] sm:$0xff] }
   0x9   :  { %v43_v6 = vadd.f32 %v103_v3, %v41_v5 }
   0xa   :  { %34 = vperm.xlu0 %114, %v32_v4   ;;  %v30_v17 = vld [vmem:[#allocation2] sm:$0xff] }
   0xb   :  { %45 = vst.msk [vmem:[#allocation3] sm:$0xff] %vm18_vm0, %v43_v6 }
  0x12   :  { %v70_v7 = vld [vmem:[#allocation3] sm:$0xff] }
  0x13   :  { %v71_v8 = vsel %vm18_vm0, %v70_v7, 0.0 }
  0x14   :  { %72 = vadd.xlane.f32.xlu2 %v71_v8 }
  0x74   :  { %v27_v11 = vpop.permute.xlu0 %26 }
  0x75   :  { %vm28_vm3 = vcmp.eq.s32.totalorder %v21_v10, %v27_v11 }
  0x76   :  { %v29_v14 = vsel %vm28_vm3, 0.9, %v143_v13 }
  0x77   :  { %v31_v15 = vmul.f32 %v29_v14, %v22_v12 }
  0x7c   :  { %v35_v16 = vpop.permute.xlu0 %34 }
  0x7d   :  { %vm36_vm4 = vcmp.eq.s32.totalorder %v35_v16, 1 }
  0x7e   :  { %v37_v18 = vsel %vm36_vm4, %v31_v15, 0.0 }
  0x7f   :  { %v38_v19 = vadd.f32 %v37_v18, %v30_v17 }
  0x81   :  { %40 = vst.msk [vmem:[#allocation2] sm:$0xff] %vm16_vm2, %v38_v19 }
  0x87   :  { %v73_v23 = vpop.xlane.xlu2 %72 }
  0x88   :  { %v49_v20 = vld [vmem:[#allocation2] sm:$0xff]  ;;  %v74_v25 = vrot.slane %v73_v23, 4 }
  0x89   :  { %v50_v21 = vsel %vm16_vm2, %v49_v20, 0.0  ;;  %v60_v22 = vsel %vm18_vm0, %v49_v20, 0.0 }
  0x8a   :  { %51 = vadd.xlane.f32.xlu1 %v50_v21  ;;  %v75_v28 = vadd.f32 %v74_v25, %v73_v23 }
  0x8c   :  { %v76_v31 = vrot.slane %v75_v28, 2 }
  0x8e   :  { %v77_v37 = vadd.f32 %v76_v31, %v75_v28 }
  0x90   :  { %v78_v40 = vrot.slane %v77_v37, 1 }
  0x92   :  { %61 = vadd.xlane.f32.xlu1 %v60_v22  ;;  %v79_v43 = vadd.f32 %v78_v40, %v77_v37 }
  0xfd   :  { %v52_v24 = vpop.xlane.xlu1 %51 }
  0xfe   :  { %v53_v26 = vrot.slane %v52_v24, 4 }
 0x100   :  { %v54_v27 = vadd.f32 %v53_v26, %v52_v24 }
 0x102   :  { %v55_v29 = vrot.slane %v54_v27, 2 }
 0x104   :  { %v56_v30 = vadd.f32 %v55_v29, %v54_v27 }
 0x105   :  { %v62_v32 = vpop.xlane.xlu1 %61 }
 0x106   :  { %v63_v33 = vrot.slane %v62_v32, 4  ;;  %v57_v34 = vrot.slane %v56_v30, 1 }
 0x108   :  { %v64_v35 = vadd.f32 %v63_v33, %v62_v32  ;;  %v58_v36 = vadd.f32 %v57_v34, %v56_v30 }
 0x10a   :  { %v65_v38 = vrot.slane %v64_v35, 2  ;;  %104 = vpush %v58_v36 }
 0x10c   :  { %v66_v39 = vadd.f32 %v65_v38, %v64_v35 }
 0x10e   :  { %v67_v41 = vrot.slane %v66_v39, 1 }
 0x110   :  { %v68_v42 = vadd.f32 %v67_v41, %v66_v39 }
 0x112   :  { %106 = vpush %v68_v42 }
 0x113   :  { %108 = vpush %v79_v43 }
 0x13b   :  { %s105_s0 = spop %104 }
 0x143   :  { %s107_s12 = spop %106 }
 0x144   :  { %s109_s13 = spop %108 }
 0x145   :  { %s81_s14 = smul.f32 -0.66520274, %s109_s13 }
 0x147   :  { %s82_s17 = ssub.f32 %s81_s14, %s105_s0 }
 0x149   :  { %s83_s21 = sadd.f32 %s107_s12, %s82_s17 }
 0x14b   :  { %v84_v44 = vstv %s83_s21 }
 0x14c   :  { %86 = vst [vmem:[#allocation4] sm:$0xff] %v84_v44 }
 0x14d   :  { %97 = dma.vmem_to_hbm [thread:$0]  %s93_s16, 128, %s95_s20, [#allocation5]  }
 0x14e   :  { %139 = dma.done.wait [#allocation5], 128  }
 0x14f   :  { %140 = vsyncadd [#allocation5], 4294967168 }
 0x150   :  { %102 = vsyncpa [#allocation5], 1 }

</bundles_post_ra>
